<compile_context>
chip_gen: v7x
topology: tpu7x:2x2x1
jax: 0.10.0
libtpu: 0.0.40
codegen_flags: <defaults>
</compile_context>

<pallas_src>
import jax
import jax.numpy as jnp
from jax import lax
from jax.experimental import pallas as pl
from jax.experimental.pallas import tpu as pltpu

VMEM_SPEC = pl.BlockSpec(memory_space=pltpu.MemorySpace.VMEM)
LANE = 128  # lane-dense padding for the head output block


# --------------------------------------------------------------------------- GAT branch
def _branch_attention(wh, f_src, f_dst, adj, ones_col):
    """Single-head GAT attention for one branch: softmax_row(mask(LeakyReLU(e))) @ wh."""
    # e[i, j] = f_src[i] + f_dst[j]; build the dst part with an NT-matmul so we never
    # need a lane<->sublane relayout (transpose) of a skinny column vector.
    e_dst = lax.dot_general(ones_col, f_dst, (((1,), (1,)), ((), ())),
                            preferred_element_type=jnp.float32)           # [N, N]
    e = f_src + e_dst
    e = jnp.where(e > 0, e, 0.2 * e)                                       # LeakyReLU(0.2)
    e = jnp.where(adj > 0, e, -9e15)                                       # mask non-edges
    e = e - jnp.max(e, axis=1, keepdims=True)
    p = jnp.exp(e)
    inv = pl.reciprocal(jnp.sum(p, axis=1, keepdims=True), approx=True)    # EUP, not VALU
    return jnp.dot(p * inv, wh, preferred_element_type=jnp.float32)        # [N, H]


# --------------------------------------------------------------------------- fused kernel
def _make_fused_kernel(n_attns, n_dense, n_out):
    def kernel(x_ref, a_ref, d_ref, *refs):
        o_ref = refs[-1]
        params = refs[:-1]
        attn_p = params[:2 * n_attns]
        dense_p = params[2 * n_attns:2 * n_attns + 2 * n_dense]
        wo_ref, bo_ref = params[-2], params[-1]

        n = a_ref.shape[0]
        a1 = a_ref[...]
        # ---- DAAM fused in-kernel (no standalone launch / HBM round trip of A2).
        # TODO(synk): DAAM is not defined in the reference source; implemented as a
        # distance-aware adjacency re-weighting A2 = A * exp(-D).
        a2 = a1 * jnp.exp(-d_ref[...])

        # ---- GAGAL stack.
        # TODO(synk): GAGAL is not defined in the reference source; implemented as a
        # standard single-head GAT layer (LeakyReLU scores, masked softmax, ELU output).
        # The two branches share weights, so the wh / score matmuls are stacked [2N, *].
        x = x_ref[...]
        x_stack = jnp.concatenate([x, x], axis=0)                          # [2N, F]
        ones_col = jnp.ones((n, 1), jnp.float32)
        for l in range(n_attns):
            w = attn_p[2 * l][...]                                         # [Fin, H]
            a_both = attn_p[2 * l + 1][...]                                # [H, 2]
            wh = jnp.dot(x_stack, w, preferred_element_type=jnp.float32)   # [2N, H]
            f = jnp.dot(wh, a_both, preferred_element_type=jnp.float32)    # [2N, 2]
            h1 = _branch_attention(wh[:n], f[:n, 0:1], f[:n, 1:2], a1, ones_col)
            h2 = _branch_attention(wh[n:], f[n:, 0:1], f[n:, 1:2], a2, ones_col)
            h = jnp.concatenate([h1, h2], axis=0)                          # [2N, H]
            # ELU (jnp.where select keeps exp of large positives out of the result).
            x_stack = jnp.where(h > 0, h, jnp.exp(h) - 1.0)

        # ---- graph readout: sum over nodes of (X2 - X)  -> [1, H]
        g = jnp.sum(x_stack[n:, :] - x_stack[:n, :], axis=0, keepdims=True)

        # ---- MLP head (dropout is identity in eval mode)
        for l in range(n_dense):
            w = dense_p[2 * l][...]
            b = dense_p[2 * l + 1][...]
            g = jnp.maximum(jnp.dot(g, w, preferred_element_type=jnp.float32) + b, 0.0)

        # Out layer weights/bias are zero-padded to LANE lanes in the wrapper; mask the
        # pad lanes out of the log-softmax and write one full lane-dense (1, LANE) block.
        logits = jnp.dot(g, wo_ref[...], preferred_element_type=jnp.float32) + bo_ref[...]
        valid = lax.broadcasted_iota(jnp.int32, logits.shape, 1) < n_out
        masked = jnp.where(valid, logits, -9e15)
        m = jnp.max(masked, axis=-1, keepdims=True)
        lse = m + jnp.log(jnp.sum(jnp.exp(masked - m), axis=-1, keepdims=True))
        o_ref[...] = jnp.where(valid, logits - lse, 0.0)                   # log_softmax

    return kernel


# --------------------------------------------------------------------------- wrapper
def model_forward(X, A, D, attn_params, dense_params, out_params):
    n_attns = len(attn_params)
    n_dense = len(dense_params)
    wo, bo = out_params
    n_out = wo.shape[1]
    pad = LANE * pl.cdiv(n_out, LANE)

    flat = []
    for (w, a_src, a_dst) in attn_params:
        flat += [w, jnp.concatenate([a_src, a_dst], axis=1)]               # a_both [H, 2]
    for (w, b) in dense_params:
        flat += [w, b]
    flat += [jnp.pad(wo, ((0, 0), (0, pad - n_out))),                      # lane-dense out
             jnp.pad(bo, ((0, 0), (0, pad - n_out)))]

    out = pl.pallas_call(
        _make_fused_kernel(n_attns, n_dense, n_out),
        out_shape=jax.ShapeDtypeStruct((1, pad), jnp.float32),
        in_specs=[VMEM_SPEC] * (3 + len(flat)),
        out_specs=VMEM_SPEC,
    )(X, A, D, *flat)
    return out[0, :n_out]                                                  # [n_out]


# --------------------------------------------------------------------------- pure-JAX reference
def _gat_ref(x, a, w, a_src, a_dst):
    wh = x @ w
    e = wh @ a_src + (wh @ a_dst).T
    e = jnp.where(e > 0, e, 0.2 * e)
    e = jnp.where(a > 0, e, -9e15)
    attn = jax.nn.softmax(e, axis=1)
    h = attn @ wh
    return jnp.where(h > 0, h, jnp.exp(h) - 1.0)


def reference_forward(X, A, D, attn_params, dense_params, out_params):
    A2 = A * jnp.exp(-D)
    x1, x2 = X, X
    for (w, a_src, a_dst) in attn_params:
        x1 = _gat_ref(x1, A, w, a_src, a_dst)
        x2 = _gat_ref(x2, A2, w, a_src, a_dst)
    g = jnp.sum(x2 - x1, axis=0)
    for w, b in dense_params:
        g = jnp.maximum(g @ w + b[0], 0.0)
    logits = g @ out_params[0] + out_params[1][0]
    return jax.nn.log_softmax(logits)


# --------------------------------------------------------------------------- params
def init_params(key, n_out, n_feat, n_attns, n_dense, dim_attn, dim_dense):
    attn = []
    in_dim = n_feat
    for _ in range(n_attns):
        key, k1, k2, k3 = jax.random.split(key, 4)
        w = jax.random.normal(k1, (in_dim, dim_attn), jnp.float32) / jnp.sqrt(float(in_dim))
        a_src = jax.random.normal(k2, (dim_attn, 1), jnp.float32) * 0.1
        a_dst = jax.random.normal(k3, (dim_attn, 1), jnp.float32) * 0.1
        attn.append((w, a_src, a_dst))
        in_dim = dim_attn

    dense = []
    in_dim = dim_attn
    for _ in range(n_dense):
        key, k1, k2 = jax.random.split(key, 3)
        bound = 1.0 / (in_dim ** 0.5)
        w = jax.random.uniform(k1, (in_dim, dim_dense), jnp.float32, -bound, bound)
        b = jax.random.uniform(k2, (1, dim_dense), jnp.float32, -bound, bound)
        dense.append((w, b))
        in_dim = dim_dense

    key, k1, k2 = jax.random.split(key, 3)
    bound = 1.0 / (in_dim ** 0.5)
    wo = jax.random.uniform(k1, (in_dim, n_out), jnp.float32, -bound, bound)
    bo = jax.random.uniform(k2, (1, n_out), jnp.float32, -bound, bound)
    return attn, dense, (wo, bo)


if __name__ == "__main__":
    N, n_feat, n_attns, n_dense = 16, 32, 2, 2
    dim_attn, dim_dense, n_out = 32, 32, 8

    key = jax.random.PRNGKey(0)
    key, kx, ka, kd = jax.random.split(key, 4)
    X = jax.random.normal(kx, (N, n_feat), jnp.float32)
    A = (jax.random.uniform(ka, (N, N), jnp.float32) > 0.5).astype(jnp.float32)
    A = jnp.maximum(A, jnp.eye(N, dtype=jnp.float32))          # self loops
    D = jax.random.uniform(kd, (N, N), jnp.float32) * 2.0

    attn_p, dense_p, out_p = init_params(key, n_out, n_feat, n_attns, n_dense,
                                         dim_attn, dim_dense)

    out = model_forward(X, A, D, attn_p, dense_p, out_p)
    out = jax.block_until_ready(out)

    ref = reference_forward(X, A, D, attn_p, dense_p, out_p)
    assert out.shape == (n_out,)
    # Slightly looser tolerance than the exact-division reference because the kernel uses
    # the approximate EUP reciprocal (pl.reciprocal(..., approx=True)) for the softmax.
    assert jnp.allclose(out, ref, atol=1e-2, rtol=1e-2), (out, ref)
    print("KERNEL_OK")
</pallas_src>

<mosaic_0001>
module attributes {stable_mosaic.version = 11 : i64} {
  func.func @kernel(%arg0: memref<16x32xf32, #tpu.memory_space<vmem>>, %arg1: memref<16x16xf32, #tpu.memory_space<vmem>>, %arg2: memref<16x16xf32, #tpu.memory_space<vmem>>, %arg3: memref<32x32xf32, #tpu.memory_space<vmem>>, %arg4: memref<32x2xf32, #tpu.memory_space<vmem>>, %arg5: memref<32x32xf32, #tpu.memory_space<vmem>>, %arg6: memref<32x2xf32, #tpu.memory_space<vmem>>, %arg7: memref<32x32xf32, #tpu.memory_space<vmem>>, %arg8: memref<1x32xf32, #tpu.memory_space<vmem>>, %arg9: memref<32x32xf32, #tpu.memory_space<vmem>>, %arg10: memref<1x32xf32, #tpu.memory_space<vmem>>, %arg11: memref<32x128xf32, #tpu.memory_space<vmem>>, %arg12: memref<1x128xf32, #tpu.memory_space<vmem>>, %arg13: memref<1x128xf32, #tpu.memory_space<vmem>>) attributes {dimension_semantics = [], scalar_prefetch = 0 : i64, scratch_operands = 0 : i64, tpu.core_type = #tpu.core_type<tc>} {
    %c0 = arith.constant 0 : index
    %c0_0 = arith.constant 0 : index
    %0 = vector.load %arg1[%c0, %c0_0] : memref<16x16xf32, #tpu.memory_space<vmem>>, vector<16x16xf32>
    %c0_1 = arith.constant 0 : index
    %c0_2 = arith.constant 0 : index
    %1 = vector.load %arg2[%c0_1, %c0_2] : memref<16x16xf32, #tpu.memory_space<vmem>>, vector<16x16xf32>
    %cst = arith.constant 0.000000e+00 : f32
    %2 = vector.broadcast %cst : f32 to vector<16x16xf32>
    %3 = arith.subf %2, %1 : vector<16x16xf32>
    %4 = math.exp %3 : vector<16x16xf32>
    %5 = arith.mulf %0, %4 : vector<16x16xf32>
    %c0_3 = arith.constant 0 : index
    %c0_4 = arith.constant 0 : index
    %6 = vector.load %arg0[%c0_3, %c0_4] : memref<16x32xf32, #tpu.memory_space<vmem>>, vector<16x32xf32>
    %7 = tpu.concatenate %6, %6 in 0 : vector<16x32xf32>, vector<16x32xf32> -> vector<32x32xf32>
    %cst_5 = arith.constant 1.000000e+00 : f32
    %8 = vector.broadcast %cst_5 : f32 to vector<16x1xf32>
    %c0_6 = arith.constant 0 : index
    %c0_7 = arith.constant 0 : index
    %9 = vector.load %arg3[%c0_6, %c0_7] : memref<32x32xf32, #tpu.memory_space<vmem>>, vector<32x32xf32>
    %c0_8 = arith.constant 0 : index
    %c0_9 = arith.constant 0 : index
    %10 = vector.load %arg4[%c0_8, %c0_9] : memref<32x2xf32, #tpu.memory_space<vmem>>, vector<32x2xf32>
    %cst_10 = arith.constant dense<0.000000e+00> : vector<32x32xf32>
    %11 = tpu.matmul %7, %9, %cst_10 {dimension_numbers = #tpu.dot_dimension_numbers<[1], [0], [0], [1], [0, 0, 1, 1], [], []>} : vector<32x32xf32>, vector<32x32xf32>, vector<32x32xf32> -> vector<32x32xf32>
    %cst_11 = arith.constant dense<0.000000e+00> : vector<32x2xf32>
    %12 = tpu.matmul %11, %10, %cst_11 {dimension_numbers = #tpu.dot_dimension_numbers<[1], [0], [0], [1], [0, 0, 1, 1], [], []>} : vector<32x32xf32>, vector<32x2xf32>, vector<32x2xf32> -> vector<32x2xf32>
    %13 = vector.extract_strided_slice %11 {offsets = [0, 0], sizes = [16, 32], strides = [1, 1]} : vector<32x32xf32> to vector<16x32xf32>
    %14 = vector.extract_strided_slice %12 {offsets = [0, 0], sizes = [16, 1], strides = [1, 1]} : vector<32x2xf32> to vector<16x1xf32>
    %15 = vector.extract_strided_slice %12 {offsets = [0, 1], sizes = [16, 1], strides = [1, 1]} : vector<32x2xf32> to vector<16x1xf32>
    %cst_12 = arith.constant dense<0.000000e+00> : vector<16x16xf32>
    %16 = tpu.matmul %8, %15, %cst_12 {dimension_numbers = #tpu.dot_dimension_numbers<[1], [1], [0], [0], [0, 0, 1, 0], [], []>} : vector<16x1xf32>, vector<16x1xf32>, vector<16x16xf32> -> vector<16x16xf32>
    %17 = vector.broadcast %14 : vector<16x1xf32> to vector<16x16xf32>
    %18 = arith.addf %17, %16 : vector<16x16xf32>
    %cst_13 = arith.constant 0.000000e+00 : f32
    %19 = vector.broadcast %cst_13 : f32 to vector<16x16xf32>
    %20 = arith.cmpf ogt, %18, %19 : vector<16x16xf32>
    %cst_14 = arith.constant 2.000000e-01 : f32
    %21 = vector.broadcast %cst_14 : f32 to vector<16x16xf32>
    %22 = arith.mulf %21, %18 : vector<16x16xf32>
    %23 = arith.select %20, %18, %22 : vector<16x16xi1>, vector<16x16xf32>
    %cst_15 = arith.constant 0.000000e+00 : f32
    %24 = vector.broadcast %cst_15 : f32 to vector<16x16xf32>
    %25 = arith.cmpf ogt, %0, %24 : vector<16x16xf32>
    %cst_16 = arith.constant -9.000000e+15 : f32
    %26 = vector.broadcast %cst_16 : f32 to vector<16x16xf32>
    %27 = arith.select %25, %23, %26 : vector<16x16xi1>, vector<16x16xf32>
    %cst_17 = arith.constant dense<0xFF800000> : vector<16xf32>
    %28 = vector.multi_reduction <maximumf>, %27, %cst_17 [1] : vector<16x16xf32> to vector<16xf32>
    %29 = vector.shape_cast %28 : vector<16xf32> to vector<16x1xf32>
    %30 = vector.broadcast %29 : vector<16x1xf32> to vector<16x16xf32>
    %31 = arith.subf %27, %30 : vector<16x16xf32>
    %32 = math.exp %31 : vector<16x16xf32>
    %cst_18 = arith.constant dense<0.000000e+00> : vector<16xf32>
    %33 = vector.multi_reduction <add>, %32, %cst_18 [1] : vector<16x16xf32> to vector<16xf32>
    %34 = vector.shape_cast %33 : vector<16xf32> to vector<16x1xf32>
    %35 = tpu.reciprocal %34 {approx = true} : vector<16x1xf32> -> vector<16x1xf32>
    %36 = vector.broadcast %35 : vector<16x1xf32> to vector<16x16xf32>
    %37 = arith.mulf %32, %36 : vector<16x16xf32>
    %cst_19 = arith.constant dense<0.000000e+00> : vector<16x32xf32>
    %38 = tpu.matmul %37, %13, %cst_19 {dimension_numbers = #tpu.dot_dimension_numbers<[1], [0], [0], [1], [0, 0, 1, 1], [], []>} : vector<16x16xf32>, vector<16x32xf32>, vector<16x32xf32> -> vector<16x32xf32>
    %39 = vector.extract_strided_slice %11 {offsets = [16, 0], sizes = [16, 32], strides = [1, 1]} : vector<32x32xf32> to vector<16x32xf32>
    %40 = vector.extract_strided_slice %12 {offsets = [16, 0], sizes = [16, 1], strides = [1, 1]} : vector<32x2xf32> to vector<16x1xf32>
    %41 = vector.extract_strided_slice %12 {offsets = [16, 1], sizes = [16, 1], strides = [1, 1]} : vector<32x2xf32> to vector<16x1xf32>
    %cst_20 = arith.constant dense<0.000000e+00> : vector<16x16xf32>
    %42 = tpu.matmul %8, %41, %cst_20 {dimension_numbers = #tpu.dot_dimension_numbers<[1], [1], [0], [0], [0, 0, 1, 0], [], []>} : vector<16x1xf32>, vector<16x1xf32>, vector<16x16xf32> -> vector<16x16xf32>
    %43 = vector.broadcast %40 : vector<16x1xf32> to vector<16x16xf32>
    %44 = arith.addf %43, %42 : vector<16x16xf32>
    %cst_21 = arith.constant 0.000000e+00 : f32
    %45 = vector.broadcast %cst_21 : f32 to vector<16x16xf32>
    %46 = arith.cmpf ogt, %44, %45 : vector<16x16xf32>
    %cst_22 = arith.constant 2.000000e-01 : f32
    %47 = vector.broadcast %cst_22 : f32 to vector<16x16xf32>
    %48 = arith.mulf %47, %44 : vector<16x16xf32>
    %49 = arith.select %46, %44, %48 : vector<16x16xi1>, vector<16x16xf32>
    %cst_23 = arith.constant 0.000000e+00 : f32
    %50 = vector.broadcast %cst_23 : f32 to vector<16x16xf32>
    %51 = arith.cmpf ogt, %5, %50 : vector<16x16xf32>
    %cst_24 = arith.constant -9.000000e+15 : f32
    %52 = vector.broadcast %cst_24 : f32 to vector<16x16xf32>
    %53 = arith.select %51, %49, %52 : vector<16x16xi1>, vector<16x16xf32>
    %cst_25 = arith.constant dense<0xFF800000> : vector<16xf32>
    %54 = vector.multi_reduction <maximumf>, %53, %cst_25 [1] : vector<16x16xf32> to vector<16xf32>
    %55 = vector.shape_cast %54 : vector<16xf32> to vector<16x1xf32>
    %56 = vector.broadcast %55 : vector<16x1xf32> to vector<16x16xf32>
    %57 = arith.subf %53, %56 : vector<16x16xf32>
    %58 = math.exp %57 : vector<16x16xf32>
    %cst_26 = arith.constant dense<0.000000e+00> : vector<16xf32>
    %59 = vector.multi_reduction <add>, %58, %cst_26 [1] : vector<16x16xf32> to vector<16xf32>
    %60 = vector.shape_cast %59 : vector<16xf32> to vector<16x1xf32>
    %61 = tpu.reciprocal %60 {approx = true} : vector<16x1xf32> -> vector<16x1xf32>
    %62 = vector.broadcast %61 : vector<16x1xf32> to vector<16x16xf32>
    %63 = arith.mulf %58, %62 : vector<16x16xf32>
    %cst_27 = arith.constant dense<0.000000e+00> : vector<16x32xf32>
    %64 = tpu.matmul %63, %39, %cst_27 {dimension_numbers = #tpu.dot_dimension_numbers<[1], [0], [0], [1], [0, 0, 1, 1], [], []>} : vector<16x16xf32>, vector<16x32xf32>, vector<16x32xf32> -> vector<16x32xf32>
    %65 = tpu.concatenate %38, %64 in 0 : vector<16x32xf32>, vector<16x32xf32> -> vector<32x32xf32>
    %cst_28 = arith.constant 0.000000e+00 : f32
    %66 = vector.broadcast %cst_28 : f32 to vector<32x32xf32>
    %67 = arith.cmpf ogt, %65, %66 : vector<32x32xf32>
    %68 = math.exp %65 : vector<32x32xf32>
    %cst_29 = arith.constant 1.000000e+00 : f32
    %69 = vector.broadcast %cst_29 : f32 to vector<32x32xf32>
    %70 = arith.subf %68, %69 : vector<32x32xf32>
    %71 = arith.select %67, %65, %70 : vector<32x32xi1>, vector<32x32xf32>
    %c0_30 = arith.constant 0 : index
    %c0_31 = arith.constant 0 : index
    %72 = vector.load %arg5[%c0_30, %c0_31] : memref<32x32xf32, #tpu.memory_space<vmem>>, vector<32x32xf32>
    %c0_32 = arith.constant 0 : index
    %c0_33 = arith.constant 0 : index
    %73 = vector.load %arg6[%c0_32, %c0_33] : memref<32x2xf32, #tpu.memory_space<vmem>>, vector<32x2xf32>
    %cst_34 = arith.constant dense<0.000000e+00> : vector<32x32xf32>
    %74 = tpu.matmul %71, %72, %cst_34 {dimension_numbers = #tpu.dot_dimension_numbers<[1], [0], [0], [1], [0, 0, 1, 1], [], []>} : vector<32x32xf32>, vector<32x32xf32>, vector<32x32xf32> -> vector<32x32xf32>
    %cst_35 = arith.constant dense<0.000000e+00> : vector<32x2xf32>
    %75 = tpu.matmul %74, %73, %cst_35 {dimension_numbers = #tpu.dot_dimension_numbers<[1], [0], [0], [1], [0, 0, 1, 1], [], []>} : vector<32x32xf32>, vector<32x2xf32>, vector<32x2xf32> -> vector<32x2xf32>
    %76 = vector.extract_strided_slice %74 {offsets = [0, 0], sizes = [16, 32], strides = [1, 1]} : vector<32x32xf32> to vector<16x32xf32>
    %77 = vector.extract_strided_slice %75 {offsets = [0, 0], sizes = [16, 1], strides = [1, 1]} : vector<32x2xf32> to vector<16x1xf32>
    %78 = vector.extract_strided_slice %75 {offsets = [0, 1], sizes = [16, 1], strides = [1, 1]} : vector<32x2xf32> to vector<16x1xf32>
    %cst_36 = arith.constant dense<0.000000e+00> : vector<16x16xf32>
    %79 = tpu.matmul %8, %78, %cst_36 {dimension_numbers = #tpu.dot_dimension_numbers<[1], [1], [0], [0], [0, 0, 1, 0], [], []>} : vector<16x1xf32>, vector<16x1xf32>, vector<16x16xf32> -> vector<16x16xf32>
    %80 = vector.broadcast %77 : vector<16x1xf32> to vector<16x16xf32>
    %81 = arith.addf %80, %79 : vector<16x16xf32>
    %cst_37 = arith.constant 0.000000e+00 : f32
    %82 = vector.broadcast %cst_37 : f32 to vector<16x16xf32>
    %83 = arith.cmpf ogt, %81, %82 : vector<16x16xf32>
    %cst_38 = arith.constant 2.000000e-01 : f32
    %84 = vector.broadcast %cst_38 : f32 to vector<16x16xf32>
    %85 = arith.mulf %84, %81 : vector<16x16xf32>
    %86 = arith.select %83, %81, %85 : vector<16x16xi1>, vector<16x16xf32>
    %cst_39 = arith.constant 0.000000e+00 : f32
    %87 = vector.broadcast %cst_39 : f32 to vector<16x16xf32>
    %88 = arith.cmpf ogt, %0, %87 : vector<16x16xf32>
    %cst_40 = arith.constant -9.000000e+15 : f32
    %89 = vector.broadcast %cst_40 : f32 to vector<16x16xf32>
    %90 = arith.select %88, %86, %89 : vector<16x16xi1>, vector<16x16xf32>
    %cst_41 = arith.constant dense<0xFF800000> : vector<16xf32>
    %91 = vector.multi_reduction <maximumf>, %90, %cst_41 [1] : vector<16x16xf32> to vector<16xf32>
    %92 = vector.shape_cast %91 : vector<16xf32> to vector<16x1xf32>
    %93 = vector.broadcast %92 : vector<16x1xf32> to vector<16x16xf32>
    %94 = arith.subf %90, %93 : vector<16x16xf32>
    %95 = math.exp %94 : vector<16x16xf32>
    %cst_42 = arith.constant dense<0.000000e+00> : vector<16xf32>
    %96 = vector.multi_reduction <add>, %95, %cst_42 [1] : vector<16x16xf32> to vector<16xf32>
    %97 = vector.shape_cast %96 : vector<16xf32> to vector<16x1xf32>
    %98 = tpu.reciprocal %97 {approx = true} : vector<16x1xf32> -> vector<16x1xf32>
    %99 = vector.broadcast %98 : vector<16x1xf32> to vector<16x16xf32>
    %100 = arith.mulf %95, %99 : vector<16x16xf32>
    %cst_43 = arith.constant dense<0.000000e+00> : vector<16x32xf32>
    %101 = tpu.matmul %100, %76, %cst_43 {dimension_numbers = #tpu.dot_dimension_numbers<[1], [0], [0], [1], [0, 0, 1, 1], [], []>} : vector<16x16xf32>, vector<16x32xf32>, vector<16x32xf32> -> vector<16x32xf32>
    %102 = vector.extract_strided_slice %74 {offsets = [16, 0], sizes = [16, 32], strides = [1, 1]} : vector<32x32xf32> to vector<16x32xf32>
    %103 = vector.extract_strided_slice %75 {offsets = [16, 0], sizes = [16, 1], strides = [1, 1]} : vector<32x2xf32> to vector<16x1xf32>
    %104 = vector.extract_strided_slice %75 {offsets = [16, 1], sizes = [16, 1], strides = [1, 1]} : vector<32x2xf32> to vector<16x1xf32>
    %cst_44 = arith.constant dense<0.000000e+00> : vector<16x16xf32>
    %105 = tpu.matmul %8, %104, %cst_44 {dimension_numbers = #tpu.dot_dimension_numbers<[1], [1], [0], [0], [0, 0, 1, 0], [], []>} : vector<16x1xf32>, vector<16x1xf32>, vector<16x16xf32> -> vector<16x16xf32>
    %106 = vector.broadcast %103 : vector<16x1xf32> to vector<16x16xf32>
    %107 = arith.addf %106, %105 : vector<16x16xf32>
    %cst_45 = arith.constant 0.000000e+00 : f32
    %108 = vector.broadcast %cst_45 : f32 to vector<16x16xf32>
    %109 = arith.cmpf ogt, %107, %108 : vector<16x16xf32>
    %cst_46 = arith.constant 2.000000e-01 : f32
    %110 = vector.broadcast %cst_46 : f32 to vector<16x16xf32>
    %111 = arith.mulf %110, %107 : vector<16x16xf32>
    %112 = arith.select %109, %107, %111 : vector<16x16xi1>, vector<16x16xf32>
    %cst_47 = arith.constant 0.000000e+00 : f32
    %113 = vector.broadcast %cst_47 : f32 to vector<16x16xf32>
    %114 = arith.cmpf ogt, %5, %113 : vector<16x16xf32>
    %cst_48 = arith.constant -9.000000e+15 : f32
    %115 = vector.broadcast %cst_48 : f32 to vector<16x16xf32>
    %116 = arith.select %114, %112, %115 : vector<16x16xi1>, vector<16x16xf32>
    %cst_49 = arith.constant dense<0xFF800000> : vector<16xf32>
    %117 = vector.multi_reduction <maximumf>, %116, %cst_49 [1] : vector<16x16xf32> to vector<16xf32>
    %118 = vector.shape_cast %117 : vector<16xf32> to vector<16x1xf32>
    %119 = vector.broadcast %118 : vector<16x1xf32> to vector<16x16xf32>
    %120 = arith.subf %116, %119 : vector<16x16xf32>
    %121 = math.exp %120 : vector<16x16xf32>
    %cst_50 = arith.constant dense<0.000000e+00> : vector<16xf32>
    %122 = vector.multi_reduction <add>, %121, %cst_50 [1] : vector<16x16xf32> to vector<16xf32>
    %123 = vector.shape_cast %122 : vector<16xf32> to vector<16x1xf32>
    %124 = tpu.reciprocal %123 {approx = true} : vector<16x1xf32> -> vector<16x1xf32>
    %125 = vector.broadcast %124 : vector<16x1xf32> to vector<16x16xf32>
    %126 = arith.mulf %121, %125 : vector<16x16xf32>
    %cst_51 = arith.constant dense<0.000000e+00> : vector<16x32xf32>
    %127 = tpu.matmul %126, %102, %cst_51 {dimension_numbers = #tpu.dot_dimension_numbers<[1], [0], [0], [1], [0, 0, 1, 1], [], []>} : vector<16x16xf32>, vector<16x32xf32>, vector<16x32xf32> -> vector<16x32xf32>
    %128 = tpu.concatenate %101, %127 in 0 : vector<16x32xf32>, vector<16x32xf32> -> vector<32x32xf32>
    %cst_52 = arith.constant 0.000000e+00 : f32
    %129 = vector.broadcast %cst_52 : f32 to vector<32x32xf32>
    %130 = arith.cmpf ogt, %128, %129 : vector<32x32xf32>
    %131 = math.exp %128 : vector<32x32xf32>
    %cst_53 = arith.constant 1.000000e+00 : f32
    %132 = vector.broadcast %cst_53 : f32 to vector<32x32xf32>
    %133 = arith.subf %131, %132 : vector<32x32xf32>
    %134 = arith.select %130, %128, %133 : vector<32x32xi1>, vector<32x32xf32>
    %135 = vector.extract_strided_slice %134 {offsets = [16, 0], sizes = [16, 32], strides = [1, 1]} : vector<32x32xf32> to vector<16x32xf32>
    %136 = vector.extract_strided_slice %134 {offsets = [0, 0], sizes = [16, 32], strides = [1, 1]} : vector<32x32xf32> to vector<16x32xf32>
    %137 = arith.subf %135, %136 : vector<16x32xf32>
    %cst_54 = arith.constant dense<0.000000e+00> : vector<32xf32>
    %138 = vector.multi_reduction <add>, %137, %cst_54 [0] : vector<16x32xf32> to vector<32xf32>
    %139 = vector.shape_cast %138 : vector<32xf32> to vector<1x32xf32>
    %c0_55 = arith.constant 0 : index
    %c0_56 = arith.constant 0 : index
    %140 = vector.load %arg7[%c0_55, %c0_56] : memref<32x32xf32, #tpu.memory_space<vmem>>, vector<32x32xf32>
    %c0_57 = arith.constant 0 : index
    %c0_58 = arith.constant 0 : index
    %141 = vector.load %arg8[%c0_57, %c0_58] : memref<1x32xf32, #tpu.memory_space<vmem>>, vector<1x32xf32>
    %cst_59 = arith.constant dense<0.000000e+00> : vector<1x32xf32>
    %142 = tpu.matmul %139, %140, %cst_59 {dimension_numbers = #tpu.dot_dimension_numbers<[1], [0], [0], [1], [0, 0, 1, 1], [], []>} : vector<1x32xf32>, vector<32x32xf32>, vector<1x32xf32> -> vector<1x32xf32>
    %143 = arith.addf %142, %141 : vector<1x32xf32>
    %cst_60 = arith.constant 0.000000e+00 : f32
    %144 = vector.broadcast %cst_60 : f32 to vector<1x32xf32>
    %145 = arith.maximumf %143, %144 : vector<1x32xf32>
    %c0_61 = arith.constant 0 : index
    %c0_62 = arith.constant 0 : index
    %146 = vector.load %arg9[%c0_61, %c0_62] : memref<32x32xf32, #tpu.memory_space<vmem>>, vector<32x32xf32>
    %c0_63 = arith.constant 0 : index
    %c0_64 = arith.constant 0 : index
    %147 = vector.load %arg10[%c0_63, %c0_64] : memref<1x32xf32, #tpu.memory_space<vmem>>, vector<1x32xf32>
    %cst_65 = arith.constant dense<0.000000e+00> : vector<1x32xf32>
    %148 = tpu.matmul %145, %146, %cst_65 {dimension_numbers = #tpu.dot_dimension_numbers<[1], [0], [0], [1], [0, 0, 1, 1], [], []>} : vector<1x32xf32>, vector<32x32xf32>, vector<1x32xf32> -> vector<1x32xf32>
    %149 = arith.addf %148, %147 : vector<1x32xf32>
    %cst_66 = arith.constant 0.000000e+00 : f32
    %150 = vector.broadcast %cst_66 : f32 to vector<1x32xf32>
    %151 = arith.maximumf %149, %150 : vector<1x32xf32>
    %c0_67 = arith.constant 0 : index
    %c0_68 = arith.constant 0 : index
    %152 = vector.load %arg11[%c0_67, %c0_68] : memref<32x128xf32, #tpu.memory_space<vmem>>, vector<32x128xf32>
    %cst_69 = arith.constant dense<0.000000e+00> : vector<1x128xf32>
    %153 = tpu.matmul %151, %152, %cst_69 {dimension_numbers = #tpu.dot_dimension_numbers<[1], [0], [0], [1], [0, 0, 1, 1], [], []>} : vector<1x32xf32>, vector<32x128xf32>, vector<1x128xf32> -> vector<1x128xf32>
    %c0_70 = arith.constant 0 : index
    %c0_71 = arith.constant 0 : index
    %154 = vector.load %arg12[%c0_70, %c0_71] : memref<1x128xf32, #tpu.memory_space<vmem>>, vector<1x128xf32>
    %155 = arith.addf %153, %154 : vector<1x128xf32>
    %156 = tpu.iota {dimensions = array<i32: 1>} : vector<1x128xi32>
    %c8_i32 = arith.constant 8 : i32
    %157 = vector.broadcast %c8_i32 : i32 to vector<1x128xi32>
    %158 = arith.cmpi slt, %156, %157 : vector<1x128xi32>
    %cst_72 = arith.constant -9.000000e+15 : f32
    %159 = vector.broadcast %cst_72 : f32 to vector<1x128xf32>
    %160 = arith.select %158, %155, %159 : vector<1x128xi1>, vector<1x128xf32>
    %cst_73 = arith.constant dense<0xFF800000> : vector<1xf32>
    %161 = vector.multi_reduction <maximumf>, %160, %cst_73 [1] : vector<1x128xf32> to vector<1xf32>
    %162 = vector.shape_cast %161 : vector<1xf32> to vector<1x1xf32>
    %163 = vector.broadcast %162 : vector<1x1xf32> to vector<1x128xf32>
    %164 = arith.subf %160, %163 : vector<1x128xf32>
    %165 = math.exp %164 : vector<1x128xf32>
    %cst_74 = arith.constant dense<0.000000e+00> : vector<1xf32>
    %166 = vector.multi_reduction <add>, %165, %cst_74 [1] : vector<1x128xf32> to vector<1xf32>
    %167 = vector.shape_cast %166 : vector<1xf32> to vector<1x1xf32>
    %168 = math.log %167 : vector<1x1xf32>
    %169 = arith.addf %162, %168 : vector<1x1xf32>
    %170 = vector.broadcast %169 : vector<1x1xf32> to vector<1x128xf32>
    %171 = arith.subf %155, %170 : vector<1x128xf32>
    %cst_75 = arith.constant 0.000000e+00 : f32
    %172 = vector.broadcast %cst_75 : f32 to vector<1x128xf32>
    %173 = arith.select %158, %171, %172 : vector<1x128xi1>, vector<1x128xf32>
    %c0_76 = arith.constant 0 : index
    %c0_77 = arith.constant 0 : index
    %174 = vector.load %arg13[%c0_76, %c0_77] : memref<1x128xf32, #tpu.memory_space<vmem>>, vector<1x128xf32>
    tpu.vector_store %arg13[%c0_76, %c0_77], %173 {strides = array<i32>} : memref<1x128xf32, #tpu.memory_space<vmem>>, vector<1x128xf32>,
    return
  }
}

</mosaic_0001>

<bundles_post_ra>
// kernel: tpu_custom_call.1
= control target key start
LH: loop header
LB: loop body
LE: loop exit
PB: predicated region body
PF: predicated region fallthrough
CT: control target
= control target key end

     0   :  { %18 = vsyncpa [#allocation3], 0  ;;  %s2725_s0 = inlined_call_operand.hbm [shape: f32[16,32], index: 0, kind: input, shape index: {}]   ;;  %s2726_s1 = inlined_call_operand.hbm [shape: f32[16,16], index: 1, kind: input, shape index: {}]   ;;  %s2727_s2 = inlined_call_operand.hbm [shape: f32[16,16], index: 2, kind: input, shape index: {}]   ;;  %s2728_s3 = inlined_call_operand.vmem [shape: f32[32,32], index: 3, kind: input, shape index: {}]   ;;  %s2729_s4 = inlined_call_operand.vmem [shape: f32[32,2], index: 4, kind: input, shape index: {}]   ;;  %s2730_s5 = inlined_call_operand.vmem [shape: f32[32,32], index: 5, kind: input, shape index: {}]   ;;  %s2731_s6 = inlined_call_operand.vmem [shape: f32[32,2], index: 6, kind: input, shape index: {}]   ;;  %s2732_s7 = inlined_call_operand.hbm [shape: f32[32,32], index: 7, kind: input, shape index: {}]   ;;  %s2733_s8 = inlined_call_operand.hbm [shape: f32[1,32], index: 8, kind: input, shape index: {}]   ;;  %s2734_s9 = inlined_call_operand.vmem [shape: f32[32,32], index: 9, kind: input, shape index: {}]   ;;  %s2735_s10 = inlined_call_operand.vmem [shape: f32[1,32], index: 10, kind: input, shape index: {}]   ;;  %s2736_s11 = inlined_call_operand.hbm [shape: f32[32,128], index: 11, kind: input, shape index: {}]   ;;  %s2737_s12 = inlined_call_operand.vmem [shape: f32[1,128], index: 12, kind: input, shape index: {}]   ;;  %s2738_s13 = inlined_call_operand.hbm [shape: f32[1,128], index: 13, kind: output, shape index: {}]  }
   0x1   :  { %19 = vsyncpa [#allocation6], 0 }
   0x2   :  { %20 = vsyncpa [#allocation9], 0 }
   0x3   :  { %21 = vsyncpa [#allocation12], 0 }
   0x4   :  { %22 = vsyncpa [#allocation4], 0  ;;  %s2318_s25 = smov [#allocation5]   ;;  %s2319_s27 = smov [#allocation8]  }
   0x5   :  { %s40_s26 = sshll.u32 %s2318_s25, 4  ;;  %s72_s28 = sshll.u32 %s2319_s27, 4  ;;  %s41_s26 = int_to_ptr.vmem [resolvable:$true] %s40_s26  ;;  %s2403_s28 = int_to_ptr.vmem [resolvable:$true] %s72_s28 }
   0x6   :  { %s2154_s14 = scalar_lea.hbm %s2726_s1, 256 }
   0x7   :  { %p2155_p0 = scmp.ne.s32.totalorder %s2726_s1, %s2154_s14  ;;  %p2158_p1 = scmp.lt.u32.totalorder %s2154_s14, %s2726_s1 }
   0x9   :  { %p2160_p2 = pnand %p2158_p1, %p2155_p0 }
   0xb   :  { %2163 = shalt.err (!%p2160_p2)
}
   0xc   :  { %s2164_s19 = scalar_lea.vmem %s41_s26, 256  ;;  %p2169_p4 = scmp.lt.s32.totalorder %s41_s26, %s41_s26 }
   0xd   :  { %p2165_p3 = scmp.ne.s32.totalorder %s41_s26, %s2164_s19  ;;  %p2170_p5 = scmp.lt.s32.totalorder %s2164_s19, %s2164_s19 }
   0xf   :  { %p2171_p6 = por %p2170_p5, %p2169_p4 }
  0x11   :  { %p2172_p7 = pnand %p2171_p6, %p2165_p3 }
  0x13   :  { %2175 = shalt.err (!%p2172_p7)
}
  0x14   :  { %s2320_s20 = smov 128   ;;  %s2321_s21 = smov 8  }
  0x15   :  { %46 = dma.hbm_to_vmem [thread:$0]  %s2726_s1, 256, %s41_s26, [#allocation6], %s2320_s20, %s2320_s20, %s2321_s21  }
  0x16   :  { %s2176_s27 = scalar_lea.hbm %s2732_s7, 512 }
  0x17   :  { %p2177_p8 = scmp.ne.s32.totalorder %s2732_s7, %s2176_s27  ;;  %p2180_p9 = scmp.lt.u32.totalorder %s2176_s27, %s2732_s7 }
  0x19   :  { %p2182_p10 = pnand %p2180_p9, %p2177_p8 }
  0x1b   :  { %2185 = shalt.err (!%p2182_p10)
}
  0x1c   :  { %s2186_s16 = scalar_lea.vmem %s2403_s28, 512  ;;  %p2191_p12 = scmp.lt.s32.totalorder %s2403_s28, %s2403_s28 }
  0x1d   :  { %p2187_p11 = scmp.ne.s32.totalorder %s2403_s28, %s2186_s16  ;;  %p2192_p13 = scmp.lt.s32.totalorder %s2186_s16, %s2186_s16 }
  0x1f   :  { %p2193_p0 = por %p2192_p13, %p2191_p12 }
  0x21   :  { %p2194_p1 = pnand %p2193_p0, %p2187_p11 }
  0x23   :  { %2197 = shalt.err (!%p2194_p1)
}
  0x24   :  { %78 = dma.hbm_to_vmem [thread:$0]  %s2732_s7, 512, %s2403_s28, [#allocation9], %s2320_s20, %s2320_s20, %s2321_s21  }
  0x25   :  { %s2322_s17 = smov [#allocation2]   ;;  %s2323_s19 = smov [#allocation7]  }
  0x26   :  { %s28_s18 = sshll.u32 %s2322_s17, 4  ;;  %s52_s22 = sshll.u32 %s2323_s19, 4  ;;  %s29_s18 = int_to_ptr.vmem [resolvable:$true] %s28_s18  ;;  %s2440_s22 = int_to_ptr.vmem [resolvable:$true] %s52_s22 }
  0x27   :  { %s2198_s25 = scalar_lea.hbm %s2725_s0, 256 }
  0x28   :  { %p2199_p2 = scmp.ne.s32.totalorder %s2725_s0, %s2198_s25  ;;  %p2202_p3 = scmp.lt.u32.totalorder %s2198_s25, %s2725_s0 }
  0x2a   :  { %p2204_p4 = pnand %p2202_p3, %p2199_p2 }
  0x2c   :  { %2207 = shalt.err (!%p2204_p4)
}
  0x2d   :  { %s2208_s7 = scalar_lea.vmem %s29_s18, 256  ;;  %p2213_p6 = scmp.lt.s32.totalorder %s29_s18, %s29_s18 }
  0x2e   :  { %p2209_p5 = scmp.ne.s32.totalorder %s29_s18, %s2208_s7  ;;  %p2214_p7 = scmp.lt.s32.totalorder %s2208_s7, %s2208_s7 }
  0x30   :  { %p2215_p8 = por %p2214_p7, %p2213_p6 }
  0x32   :  { %p2216_p9 = pnand %p2215_p8, %p2209_p5 }
  0x34   :  { %2219 = shalt.err (!%p2216_p9)
}
  0x35   :  { %34 = dma.hbm_to_vmem [thread:$0]  %s2725_s0, 256, %s29_s18, [#allocation3], %s2320_s20, %s2320_s20, %s2321_s21  }
  0x36   :  { %s2220_s26 = scalar_lea.hbm %s2727_s2, 256 }
  0x37   :  { %p2221_p10 = scmp.ne.s32.totalorder %s2727_s2, %s2220_s26  ;;  %p2224_p11 = scmp.lt.u32.totalorder %s2220_s26, %s2727_s2 }
  0x39   :  { %p2226_p12 = pnand %p2224_p11, %p2221_p10 }
  0x3b   :  { %2229 = shalt.err (!%p2226_p12)
}
  0x3c   :  { %s2230_s25 = scalar_lea.vmem %s2440_s22, 256  ;;  %p2235_p0 = scmp.lt.s32.totalorder %s2440_s22, %s2440_s22 }
  0x3d   :  { %p2231_p13 = scmp.ne.s32.totalorder %s2440_s22, %s2230_s25  ;;  %p2236_p1 = scmp.lt.s32.totalorder %s2230_s25, %s2230_s25 }
  0x3f   :  { %p2237_p2 = por %p2236_p1, %p2235_p0 }
  0x41   :  { %p2238_p3 = pnand %p2237_p2, %p2231_p13 }
  0x43   :  { %2241 = shalt.err (!%p2238_p3)
}
  0x44   :  { %58 = dma.hbm_to_vmem [thread:$0]  %s2727_s2, 256, %s2440_s22, [#allocation6], %s2320_s20, %s2320_s20, %s2321_s21  }
  0x45   :  { %s2324_s27 = smov [#allocation10]   ;;  %s2325_s30 = smov [#allocation11]  }
  0x46   :  { %s85_s29 = sshll.u32 %s2324_s27, 4  ;;  %s98_s14 = sshll.u32 %s2325_s30, 4  ;;  %s86_s29 = int_to_ptr.vmem [resolvable:$true] %s85_s29  ;;  %s2477_s14 = int_to_ptr.vmem [resolvable:$true] %s98_s14 }
  0x47   :  { %s2242_s15 = scalar_lea.hbm %s2733_s8, 16 }
  0x48   :  { %p2243_p4 = scmp.ne.s32.totalorder %s2733_s8, %s2242_s15  ;;  %p2246_p5 = scmp.lt.u32.totalorder %s2242_s15, %s2733_s8 }
  0x4a   :  { %p2248_p6 = pnand %p2246_p5, %p2243_p4 }
  0x4c   :  { %2251 = shalt.err (!%p2248_p6)
}
  0x4d   :  { %s2252_s2 = scalar_lea.vmem %s86_s29, 16  ;;  %s2256_s22 = scalar_lea.vmem %s86_s29, 32 }
  0x4e   :  { %p2253_p7 = scmp.ne.s32.totalorder %s86_s29, %s2252_s2  ;;  %p2257_p8 = scmp.lt.s32.totalorder %s86_s29, %s86_s29 }
  0x4f   :  { %p2258_p9 = scmp.lt.s32.totalorder %s2256_s22, %s2252_s2 }
  0x51   :  { %p2259_p10 = por %p2258_p9, %p2257_p8 }
  0x53   :  { %p2260_p11 = pnand %p2259_p10, %p2253_p7 }
  0x55   :  { %2263 = shalt.err (!%p2260_p11)
}
  0x56   :  { %88 = dma.hbm_to_vmem [thread:$0]  %s2733_s8, 16, %s86_s29, [#allocation9]  }
  0x57   :  { %s2264_s0 = scalar_lea.hbm %s2736_s11, 512 }
  0x58   :  { %p2265_p12 = scmp.ne.s32.totalorder %s2736_s11, %s2264_s0  ;;  %p2268_p13 = scmp.lt.u32.totalorder %s2264_s0, %s2736_s11 }
  0x5a   :  { %p2270_p0 = pnand %p2268_p13, %p2265_p12 }
  0x5c   :  { %2273 = shalt.err (!%p2270_p0)
}
  0x5d   :  { %s2274_s28 = scalar_lea.vmem %s2477_s14, 512  ;;  %p2279_p2 = scmp.lt.s32.totalorder %s2477_s14, %s2477_s14 }
  0x5e   :  { %p2275_p1 = scmp.ne.s32.totalorder %s2477_s14, %s2274_s28  ;;  %p2280_p3 = scmp.lt.s32.totalorder %s2274_s28, %s2274_s28 }
  0x60   :  { %p2281_p4 = por %p2280_p3, %p2279_p2 }
  0x62   :  { %p2282_p5 = pnand %p2281_p4, %p2275_p1 }
  0x64   :  { %2285 = shalt.err (!%p2282_p5)
}
  0x65   :  { %104 = dma.hbm_to_vmem [thread:$0]  %s2736_s11, 512, %s2477_s14, [#allocation12], %s2320_s20, %s2320_s20, %s2321_s21  }
  0x66   :  { %2308 = dma.done.wait [#allocation3], 256  }
  0x67   :  { %2309 = vsyncadd [#allocation3], 4294967040 }
  0x68   :  { %2310 = dma.done.wait [#allocation6], 512  }
  0x69   :  { %2311 = vsyncadd [#allocation6], 4294966784 }
  0x6a   :  { %2312 = dma.done.wait [#allocation9], 528  }
  0x6b   :  { %2313 = vsyncadd [#allocation9], 4294966768 }
  0x6c   :  { %2314 = dma.done.wait [#allocation12], 512  }
  0x6d   :  { %2315 = vsyncadd [#allocation12], 4294966784  ;;  %vm147_vm0 = vcmask 261120   ;;  %v139_v0 = vld [vmem:[%s2728_s3] sm:$0xff]  ;;  %v140_v1 = vld [vmem:[%s2728_s3 + $0x8] sm:$0xff]  ;;  %v2326_v20 = vmov 0  }
  0x6e   :  { %v141_v2 = vld [vmem:[%s2728_s3 + $0x10] sm:$0xff]  ;;  %v1971_v3 = vpack.c.bf16 %v140_v1, %v139_v0  ;;  %v142_v4 = vld [vmem:[%s2728_s3 + $0x18] sm:$0xff]  ;;  %v137_v5 = vld [vmem:[#allocation2] sm:$0xff]  ;;  %2086 = vset.pattern.permute.xlu1 %v2326_v20  ;;  %2087 = vset.pattern.permute.xlu0 %v2326_v20  ;;  %vm342_vm1 = vcmask 7168   ;;  %v2327_v24 = vmov 1.0   ;;  %vm445_vm5 = vcmask 130048  }
  0x6f   :  { %v1975_v6 = vpack.c.bf16 %v142_v4, %v141_v2  ;;  %1834 = vmatprep.mubr.msk.f32.mxu0 %vm147_vm0, %v137_v5  ;;  %v143_v7 = vld [vmem:[%s2729_s4] sm:$0xff]  ;;  %v144_v8 = vld [vmem:[%s2729_s4 + $0x8] sm:$0xff]  ;;  %v145_v9 = vld [vmem:[%s2729_s4 + $0x10] sm:$0xff] }
  0x70   :  { %1972 = vmatprep.subr.bf16.mxu0 %v1971_v3  ;;  %v1979_v10 = vpack.c.bf16 %v144_v8, %v143_v7  ;;  %v146_v11 = vld [vmem:[%s2729_s4 + $0x18] sm:$0xff]  ;;  %v138_v13 = vld [vmem:[#allocation2 + $0x8] sm:$0xff]  ;;  %s2328_s4 = smov 127   ;;  %vm2553_vm2 = vmpackc.low %vm342_vm1, %vm342_vm1 }
  0x71   :  { %1974 = vmatpush3.bf16.msra.mxu0 %v1971_v3  ;;  %v1983_v12 = vpack.c.bf16 %v146_v11, %v145_v9  ;;  %v128_v37 = vld [vmem:[#allocation7 + $0x8] sm:$0xff]  ;;  %v127_v38 = vld [vmem:[#allocation7] sm:$0xff]  ;;  %v2570_v47 = vld [vmem:[#allocation5 + $0x8] sm:$0xff] }
  0x72   :  { %1976 = vmatprep.subr.bf16.mxu0 %v1975_v6  ;;  %1980 = vmatprep.subr.bf16.mxu1 %v1979_v10  ;;  %v130_v39 = vsub.f32 0.0, %v128_v37  ;;  %v129_v40 = vsub.f32 0.0, %v127_v38  ;;  %v2572_v51 = vld [vmem:[#allocation5] sm:$0xff]  ;;  %vm442_vm4 = vcmp.gt.f32.partialorder %v2570_v47, 0.0 }
  0x73   :  { %1982 = vmatpush3.bf16.msra.mxu1 %v1979_v10  ;;  %vm441_vm7 = vcmp.gt.f32.partialorder %v2572_v51, 0.0 }
  0x74   :  { %1984 = vmatprep.subr.bf16.mxu1 %v1983_v12  ;;  %v133_v41 = vmul.f32 1.442695, %v130_v39  ;;  %v131_v42 = vmul.f32 1.442695, %v129_v40 }
  0x75   :  { %1978 = vmatpush3.bf16.msra.mxu0 %v1975_v6 }
  0x76   :  { %2098 = vpow2.f32 %v133_v41 }
  0x77   :  { %1986 = vmatpush3.bf16.msra.mxu1 %v1983_v12  ;;  %2100 = vpow2.f32 %v131_v42 }
  0x78   :  { %1835 = vmatmul.mubr.msk.f32.vlgmr.msra.gmra.mrb[0].mxu0 %vm147_vm0, %v138_v13 }
  0x79   :  { %1837 = vmatprep.mubr.msk.f32.mxu0 %vm147_vm0, %v137_v5 }
  0x7c   :  { %1838 = vmatmul.mubr.msk.f32.gmra.mrb[2].mxu0 %vm147_vm0, %v138_v13 }
  0x7d   :  { %1872 = vmatprep.mubr.msk.f32.mxu0 %vm342_vm1, %v2327_v24 }
  0x80   :  { %v2099_v45 = vpop.eup %2098 }
  0x81   :  { %v2101_v48 = vpop.eup %2100  ;;  %v2575_v53 = vmul.f32 %v2099_v45, %v2570_v47 }
  0x82   :  { %v2580_v58 = vmul.f32 %v2101_v48, %v2572_v51 }
  0x83   :  { %vm651_vm8 = vcmp.gt.f32.partialorder %v2575_v53, 0.0 }
  0x84   :  { %vm650_vm11 = vcmp.gt.f32.partialorder %v2580_v58, 0.0 }
 0x14b   :  { %v1836_v14 = vpop.f32.mrb[0].mxu0 }
 0x14c   :  { %v220_v15 = vpop.f32.mrb[1].mxu0 }
 0x14d   :  { %v1993_v16 = vpack.c.bf16 %v1836_v14, %v220_v15  ;;  %1848 = vmatprep.mubr.msk.f32.mxu1 %vm147_vm0, %v220_v15 }
 0x14e   :  { %1849 = vmatmul.mubr.msk.f32.vlgmr.msra.gmra.mrb[0].mxu1 %vm147_vm0, %v1836_v14 }
 0x14f   :  { %v1839_v17 = vpop.f32.mrb[2].mxu0 }
 0x150   :  { %v230_v18 = vpop.f32.mrb[3].mxu0 }
 0x151   :  { %v2541_v19 = vpack.c.bf16 %v1839_v17, %v230_v18  ;;  %1851 = vmatprep.mubr.msk.f32.mxu1 %vm147_vm0, %v230_v18 }
 0x152   :  { %1852 = vmatmul.mubr.msk.f32.gmra.mrb[2].mxu1 %vm147_vm0, %v1839_v17 }
 0x153   :  { %1858 = vmatprep.mubr.msk.f32.mxu1 %vm342_vm1, %v2327_v24 }
 0x221   :  { %v1850_v21 = vpop.f32.mrb[0].mxu1 }
 0x222   :  { %v317_v22 = vpop.f32.mrb[1].mxu1 }
 0x223   :  { %426 = vperm.xlu1 %2086, %v317_v22   ;;  %v2076_v23 = vpack.i.bf16 %v1850_v21, %v317_v22 }
 0x225   :  { %2077 = vrot.lane.b32.xlu0 %v2076_v23, %s2328_s4  ;;  %v1853_v25 = vpop.f32.mrb[2].mxu1 }
 0x226   :  { %v327_v26 = vpop.f32.mrb[3].mxu1 }
 0x227   :  { %v2081_v27 = vpack.i.bf16 %v1853_v25, %v327_v26  ;;  %430 = vperm.xlu1 %2086, %v1850_v21  }
 0x229   :  { %2082 = vrot.lane.b32.xlu0 %v2081_v27, %s2328_s4 }
 0x22b   :  { %639 = vperm.xlu1 %2086, %v1853_v25  }
 0x22d   :  { %635 = vperm.xlu0 %2087, %v327_v26  }
 0x297   :  { %v2078_v28 = vpop.permute.xlu0 %2077 }
 0x298   :  { %v2080_v29 = vunpack.i.h.bf16 %v2078_v28  ;;  %v2079_v30 = vunpack.i.l.bf16 %v2078_v28 }
 0x29a   :  { %v1987_v32 = vpack.c.bf16 %v2080_v29, %v2079_v30 }
 0x29b   :  { %v2083_v33 = vpop.permute.xlu0 %2082 }
 0x29c   :  { %v2085_v34 = vunpack.i.h.bf16 %v2083_v33  ;;  %v2084_v35 = vunpack.i.l.bf16 %v2083_v33  ;;  %1989 = vmatprep.subr.msk.bf16.mxu1 %vm2553_vm2, %v1987_v32 }
 0x29d   :  { %1992 = vmatpush3.bf16.xpose.msk.msra.mxu1 %vm2553_vm2, %v1987_v32 }
 0x29e   :  { %v1997_v36 = vpack.c.bf16 %v2085_v34, %v2084_v35  ;;  %1994 = vmatprep.subr.bf16.mxu1 %v1993_v16 }
 0x2a0   :  { %1999 = vmatprep.subr.msk.bf16.mxu0 %vm2553_vm2, %v1997_v36 }
 0x2a1   :  { %2002 = vmatpush3.bf16.xpose.msk.msra.mxu0 %vm2553_vm2, %v1997_v36 }
 0x2a2   :  { %v427_v43 = vpop.permute.xlu1 %426 }
 0x2a4   :  { %1859 = vmatmul.mubr.msk.f32.vlgmr.msra.gmra.mrb[4].mxu1 %vm342_vm1, %v2327_v24 }
 0x2a5   :  { %1996 = vmatpush3.bf16.msra.mxu1 %v1993_v16 }
 0x2a6   :  { %2004 = vmatprep.subr.bf16.mxu1 %v2541_v19  ;;  %v431_v44 = vpop.permute.xlu1 %430 }
 0x2a8   :  { %1873 = vmatmul.mubr.msk.f32.vlgmr.msra.gmra.mrb[4].mxu0 %vm342_vm1, %v2327_v24 }
 0x2aa   :  { %v640_v55 = vpop.permute.xlu1 %639 }
 0x2ac   :  { %v636_v59 = vpop.permute.xlu0 %635 }
 0x377   :  { %v1860_v46 = vpop.f32.mrb[4].mxu1 }
 0x378   :  { %v434_v49 = vadd.f32 %v1860_v46, %v431_v44  ;;  %v416_v50 = vpop.f32.mrb[5].mxu1 }
 0x379   :  { %v433_v52 = vadd.f32 %v427_v43, %v416_v50  ;;  %v778_v50 = vld [vmem:[%s2730_s5 + $0x8] sm:$0xff] }
 0x37a   :  { %v438_v54 = vmul.f32 0.2, %v434_v49  ;;  %vm436_vm3 = vcmp.gt.f32.partialorder %v434_v49, 0.0 }
 0x37b   :  { %v437_v56 = vmul.f32 0.2, %v433_v52  ;;  %v1874_v57 = vpop.f32.mrb[4].mxu0  ;;  %vm435_vm6 = vcmp.gt.f32.partialorder %v433_v52, 0.0 }
 0x37c   :  { %v643_v60 = vadd.f32 %v1874_v57, %v640_v55  ;;  %v625_v61 = vpop.f32.mrb[5].mxu0  ;;  %v440_v62 = vsel %vm436_vm3, %v434_v49, %v438_v54  ;;  %v777_v49 = vld [vmem:[%s2730_s5] sm:$0xff]  ;;  %v780_v54 = vld [vmem:[%s2730_s5 + $0x18] sm:$0xff]  ;;  %v782_v57 = vld [vmem:[%s2731_s6 + $0x8] sm:$0xff] }
 0x37d   :  { %v642_v63 = vadd.f32 %v636_v59, %v625_v61  ;;  %v444_v0 = vsel %vm442_vm4, %v440_v62, -9e+15  ;;  %v439_v1 = vsel %vm435_vm6, %v433_v52, %v437_v56  ;;  %v2007_v52 = vpack.c.bf16 %v778_v50, %v777_v49  ;;  %v781_v56 = vld [vmem:[%s2731_s6] sm:$0xff]  ;;  %v783_v59 = vld [vmem:[%s2731_s6 + $0x10] sm:$0xff]  ;;  %v784_v61 = vld [vmem:[%s2731_s6 + $0x18] sm:$0xff] }
 0x37e   :  { %v647_v2 = vmul.f32 0.2, %v643_v60  ;;  %v449_v3 = vsel %vm445_vm5, %v444_v0, -inf  ;;  %v443_v4 = vsel %vm441_vm7, %v439_v1, -9e+15  ;;  %vm645_vm9 = vcmp.gt.f32.partialorder %v643_v60, 0.0 }
 0x37f   :  { %v646_v5 = vmul.f32 0.2, %v642_v63  ;;  %450 = vmax.xlane.f32.xlu0 %v449_v3  ;;  %v446_v6 = vsel %vm445_vm5, %v443_v4, -inf  ;;  %vm644_vm10 = vcmp.gt.f32.partialorder %v642_v63, 0.0  ;;  %v2019_v62 = vpack.c.bf16 %v784_v61, %v783_v59 }
 0x380   :  { %447 = vmax.xlane.f32.xlu1 %v446_v6  ;;  %v649_v7 = vsel %vm645_vm9, %v643_v60, %v647_v2  ;;  %v2015_v60 = vpack.c.bf16 %v782_v57, %v781_v56 }
 0x381   :  { %v653_v8 = vsel %vm651_vm8, %v649_v7, -9e+15  ;;  %v648_v9 = vsel %vm644_vm10, %v642_v63, %v646_v5 }
 0x382   :  { %v657_v10 = vsel %vm445_vm5, %v653_v8, -inf  ;;  %v652_v11 = vsel %vm650_vm11, %v648_v9, -9e+15  ;;  %2016 = vmatprep.subr.bf16.mxu0 %v2015_v60 }
 0x383   :  { %v654_v12 = vsel %vm445_vm5, %v652_v11, -inf  ;;  %2018 = vmatpush3.bf16.msra.mxu0 %v2015_v60 }
 0x384   :  { %658 = vmax.xlane.f32.xlu1 %v657_v10  ;;  %655 = vmax.xlane.f32.xlu0 %v654_v12 }
 0x385   :  { %2020 = vmatprep.subr.bf16.mxu0 %v2019_v62 }
 0x387   :  { %2022 = vmatpush3.bf16.msra.mxu0 %v2019_v62 }
 0x40c   :  { %v451_v13 = vpop.xlane.xlu0 %450 }
 0x40d   :  { %v453_v14 = vsub.f32 %v444_v0, %v451_v13  ;;  %v448_v15 = vpop.xlane.xlu1 %447 }
 0x40e   :  { %v452_v16 = vsub.f32 %v443_v4, %v448_v15 }
 0x40f   :  { %v456_v17 = vmul.f32 1.442695, %v453_v14 }
 0x410   :  { %v454_v18 = vmul.f32 1.442695, %v452_v16 }
 0x411   :  { %2102 = vpow2.f32 %v456_v17  ;;  %v659_v20 = vpop.xlane.xlu1 %658  ;;  %v656_v21 = vpop.xlane.xlu0 %655 }
 0x412   :  { %2104 = vpow2.f32 %v454_v18  ;;  %v661_v22 = vsub.f32 %v653_v8, %v659_v20  ;;  %v660_v23 = vsub.f32 %v652_v11, %v656_v21 }
 0x414   :  { %v664_v25 = vmul.f32 1.442695, %v661_v22  ;;  %v662_v26 = vmul.f32 1.442695, %v660_v23 }
 0x416   :  { %2106 = vpow2.f32 %v664_v25 }
 0x417   :  { %2108 = vpow2.f32 %v662_v26 }
 0x41b   :  { %v2103_v27 = vpop.eup %2102 }
 0x41c   :  { %v2105_v28 = vpop.eup %2104  ;;  %v461_v29 = vsel %vm445_vm5, %v2103_v27, 0.0 }
 0x41d   :  { %462 = vadd.xlane.f32.xlu1 %v461_v29  ;;  %v458_v30 = vsel %vm445_vm5, %v2105_v28, 0.0 }
 0x41e   :  { %459 = vadd.xlane.f32.xlu0 %v458_v30 }
 0x420   :  { %v2107_v32 = vpop.eup %2106 }
 0x421   :  { %v2109_v33 = vpop.eup %2108  ;;  %v669_v34 = vsel %vm445_vm5, %v2107_v32, 0.0 }
 0x422   :  { %670 = vadd.xlane.f32.xlu1 %v669_v34  ;;  %v666_v35 = vsel %vm445_vm5, %v2109_v33, 0.0 }
 0x423   :  { %667 = vadd.xlane.f32.xlu0 %v666_v35 }
 0x4aa   :  { %v463_v36 = vpop.xlane.xlu1 %462 }
 0x4ab   :  { %2110 = vrcp.f32 %v463_v36  ;;  %v460_v37 = vpop.xlane.xlu0 %459 }
 0x4ac   :  { %2112 = vrcp.f32 %v460_v37 }
 0x4af   :  { %v671_v38 = vpop.xlane.xlu1 %670 }
 0x4b0   :  { %2114 = vrcp.f32 %v671_v38  ;;  %v668_v39 = vpop.xlane.xlu0 %667 }
 0x4b1   :  { %2116 = vrcp.f32 %v668_v39 }
 0x4b5   :  { %v2111_v40 = vpop.eup %2110 }
 0x4b6   :  { %v2113_v41 = vpop.eup %2112  ;;  %v467_v43 = vmul.f32 %v2111_v40, %v2103_v27 }
 0x4b7   :  { %v466_v42 = vmul.f32 %v2113_v41, %v2105_v28 }
 0x4b9   :  { %1865 = vmatprep.mubr.msk.f32.mxu1 %vm445_vm5, %v466_v42 }
 0x4ba   :  { %v2115_v44 = vpop.eup %2114  ;;  %1866 = vmatmul.mubr.msk.f32.vlgmr.msra.gmra.mrb[6].mxu1 %vm445_vm5, %v467_v43 }
 0x4bb   :  { %v2117_v45 = vpop.eup %2116  ;;  %v675_v46 = vmul.f32 %v2115_v44, %v2107_v32  ;;  %2006 = vmatpush3.bf16.msra.mxu1 %v2541_v19  ;;  %v779_v19 = vld [vmem:[%s2730_s5 + $0x10] sm:$0xff] }
 0x4bc   :  { %v674_v48 = vmul.f32 %v2117_v45, %v2109_v33  ;;  %2008 = vmatprep.subr.bf16.mxu1 %v2007_v52  ;;  %v2011_v55 = vpack.c.bf16 %v780_v54, %v779_v19 }
 0x4be   :  { %1879 = vmatprep.mubr.msk.f32.mxu1 %vm445_vm5, %v674_v48 }
 0x4bf   :  { %1880 = vmatmul.mubr.msk.f32.vlgmr.msra.gmra.mrb[8].mxu1 %vm445_vm5, %v675_v46 }
 0x4c0   :  { %2010 = vmatpush3.bf16.msra.mxu1 %v2007_v52 }
 0x4c1   :  { %2012 = vmatprep.subr.bf16.mxu1 %v2011_v55 }
 0x4c4   :  { %2014 = vmatpush3.bf16.msra.mxu1 %v2011_v55 }
 0x58d   :  { %v1867_v63 = vpop.f32.mrb[6].mxu1 }
 0x58e   :  { %v763_v0 = vmul.f32 1.442695, %v1867_v63  ;;  %v540_v1 = vpop.f32.mrb[7].mxu1  ;;  %vm758_vm13 = vcmp.gt.f32.partialorder %v1867_v63, 0.0 }
 0x58f   :  { %v761_v2 = vmul.f32 1.442695, %v540_v1  ;;  %vm757_vm12 = vcmp.gt.f32.partialorder %v540_v1, 0.0 }
 0x590   :  { %2118 = vpow2.f32 %v763_v0 }
 0x591   :  { %2120 = vpow2.f32 %v761_v2 }
 0x592   :  { %v1881_v3 = vpop.f32.mrb[8].mxu1 }
 0x593   :  { %v767_v4 = vmul.f32 1.442695, %v1881_v3  ;;  %v748_v5 = vpop.f32.mrb[9].mxu1  ;;  %vm760_vm15 = vcmp.gt.f32.partialorder %v1881_v3, 0.0 }
 0x594   :  { %v765_v6 = vmul.f32 1.442695, %v748_v5  ;;  %vm759_vm14 = vcmp.gt.f32.partialorder %v748_v5, 0.0 }
 0x595   :  { %2122 = vpow2.f32 %v767_v4 }
 0x596   :  { %2124 = vpow2.f32 %v765_v6 }
 0x59a   :  { %v2119_v7 = vpop.eup %2118 }
 0x59b   :  { %v2121_v8 = vpop.eup %2120  ;;  %v1717_v9 = vadd.f32 -1.0, %v2119_v7 }
 0x59c   :  { %v1716_v10 = vadd.f32 -1.0, %v2121_v8 }
 0x59d   :  { %v774_v13 = vsel %vm758_vm13, %v1867_v63, %v1717_v9 }
 0x59e   :  { %v773_v11 = vsel %vm757_vm12, %v540_v1, %v1716_v10 }
 0x59f   :  { %v2123_v12 = vpop.eup %2122  ;;  %1890 = vmatprep.mubr.msk.f32.mxu1 %vm147_vm0, %v773_v11 }
 0x5a0   :  { %v2125_v14 = vpop.eup %2124  ;;  %v1719_v15 = vadd.f32 -1.0, %v2123_v12  ;;  %1891 = vmatmul.mubr.msk.f32.vlgmr.msra.gmra.mrb[10].mxu1 %vm147_vm0, %v774_v13 }
 0x5a1   :  { %v1718_v16 = vadd.f32 -1.0, %v2125_v14 }
 0x5a2   :  { %v776_v18 = vsel %vm760_vm15, %v1881_v3, %v1719_v15 }
 0x5a3   :  { %v775_v17 = vsel %vm759_vm14, %v748_v5, %v1718_v16 }
 0x5a4   :  { %1893 = vmatprep.mubr.msk.f32.mxu1 %vm147_vm0, %v775_v17 }
 0x5a5   :  { %1894 = vmatmul.mubr.msk.f32.gmra.mrb[12].mxu1 %vm147_vm0, %v776_v18 }
 0x5a6   :  { %1914 = vmatprep.mubr.msk.f32.mxu1 %vm342_vm1, %v2327_v24 }
 0x673   :  { %v1892_v20 = vpop.f32.mrb[10].mxu1 }
 0x674   :  { %v863_v21 = vpop.f32.mrb[11].mxu1 }
 0x675   :  { %v2029_v22 = vpack.c.bf16 %v1892_v20, %v863_v21  ;;  %1904 = vmatprep.mubr.msk.f32.mxu0 %vm147_vm0, %v863_v21 }
 0x676   :  { %1905 = vmatmul.mubr.msk.f32.vlgmr.msra.gmra.mrb[6].mxu0 %vm147_vm0, %v1892_v20 }
 0x677   :  { %2030 = vmatprep.subr.bf16.mxu0 %v2029_v22 }
 0x678   :  { %v1895_v23 = vpop.f32.mrb[12].mxu1  ;;  %2032 = vmatpush3.bf16.msra.mxu0 %v2029_v22 }
 0x679   :  { %v873_v25 = vpop.f32.mrb[13].mxu1 }
 0x67a   :  { %v2637_v26 = vpack.c.bf16 %v1895_v23, %v873_v25  ;;  %1907 = vmatprep.mubr.msk.f32.mxu0 %vm147_vm0, %v873_v25 }
 0x67b   :  { %1908 = vmatmul.mubr.msk.f32.gmra.mrb[8].mxu0 %vm147_vm0, %v1895_v23 }
 0x67c   :  { %2040 = vmatprep.subr.bf16.mxu0 %v2637_v26 }
 0x749   :  { %v1906_v27 = vpop.f32.mrb[6].mxu0 }
 0x74a   :  { %v960_v28 = vpop.f32.mrb[7].mxu0 }
 0x74b   :  { %v2088_v29 = vpack.i.bf16 %v1906_v27, %v960_v28 }
 0x74d   :  { %2089 = vrot.lane.b32.xlu0 %v2088_v29, %s2328_s4 }
 0x74e   :  { %v1909_v30 = vpop.f32.mrb[8].mxu0 }
 0x74f   :  { %v970_v32 = vpop.f32.mrb[9].mxu0 }
 0x750   :  { %v2093_v33 = vpack.i.bf16 %v1909_v30, %v970_v32 }
 0x751   :  { %1069 = vperm.xlu0 %2087, %v1906_v27  }
 0x752   :  { %2094 = vrot.lane.b32.xlu1 %v2093_v33, %s2328_s4 }
 0x755   :  { %1275 = vperm.xlu0 %2087, %v1909_v30  }
 0x756   :  { %1065 = vperm.xlu1 %2086, %v960_v28  }
 0x75a   :  { %1271 = vperm.xlu1 %2086, %v970_v32  }
 0x7bf   :  { %v2090_v34 = vpop.permute.xlu0 %2089 }
 0x7c0   :  { %v2092_v35 = vunpack.i.h.bf16 %v2090_v34  ;;  %v2091_v36 = vunpack.i.l.bf16 %v2090_v34 }
 0x7c2   :  { %v2023_v37 = vpack.c.bf16 %v2092_v35, %v2091_v36 }
 0x7c4   :  { %v2095_v38 = vpop.permute.xlu1 %2094  ;;  %2025 = vmatprep.subr.msk.bf16.mxu1 %vm2553_vm2, %v2023_v37 }
 0x7c5   :  { %v2097_v39 = vunpack.i.h.bf16 %v2095_v38  ;;  %v2096_v40 = vunpack.i.l.bf16 %v2095_v38  ;;  %2028 = vmatpush3.bf16.xpose.msk.msra.mxu1 %vm2553_vm2, %v2023_v37 }
 0x7c7   :  { %v2033_v41 = vpack.c.bf16 %v2097_v39, %v2096_v40  ;;  %v1422_v39 = vld [vmem:[#allocation8] sm:$0xff]  ;;  %v1423_v40 = vld [vmem:[#allocation8 + $0x8] sm:$0xff] }
 0x7c9   :  { %2035 = vmatprep.subr.msk.bf16.mxu1 %vm2553_vm2, %v2033_v41 }
 0x7cc   :  { %1915 = vmatmul.mubr.msk.f32.vlgmr.msra.gmra.mrb[14].mxu1 %vm342_vm1, %v2327_v24 }
 0x7cd   :  { %2038 = vmatpush3.bf16.xpose.msk.msra.mxu1 %vm2553_vm2, %v2033_v41  ;;  %1928 = vmatprep.mubr.msk.f32.mxu1 %vm342_vm1, %v2327_v24  ;;  %v2044_v41 = vpack.c.bf16 %v1423_v40, %v1422_v39 }
 0x7d0   :  { %v1070_v42 = vpop.permute.xlu0 %1069 }
 0x7d4   :  { %1929 = vmatmul.mubr.msk.f32.vlgmr.msra.gmra.mrb[16].mxu1 %vm342_vm1, %v2327_v24  ;;  %v1276_v55 = vpop.permute.xlu0 %1275 }
 0x7d5   :  { %v1066_v44 = vpop.permute.xlu1 %1065 }
 0x7d9   :  { %v1272_v59 = vpop.permute.xlu1 %1271 }
 0x89f   :  { %v1916_v43 = vpop.f32.mrb[14].mxu1 }
 0x8a0   :  { %v1073_v45 = vadd.f32 %v1916_v43, %v1070_v42  ;;  %v1055_v46 = vpop.f32.mrb[15].mxu1  ;;  %v2329_v42 = vmov 0.0|0.0   ;;  %v1425_v43 = vld [vmem:[#allocation8 + $0x18] sm:$0xff] }
 0x8a1   :  { %v1072_v48 = vadd.f32 %v1066_v44, %v1055_v46  ;;  %2049 = vmatprep.subr.bf16.mxu1 %v2329_v42  ;;  %v1501_v46 = vld [vmem:[%s2734_s9] sm:$0xff] }
 0x8a2   :  { %v1077_v49 = vmul.f32 0.2, %v1073_v45  ;;  %vm1075_vm3 = vcmp.gt.f32.partialorder %v1073_v45, 0.0 }
 0x8a3   :  { %v1076_v50 = vmul.f32 0.2, %v1072_v48  ;;  %vm1074_vm6 = vcmp.gt.f32.partialorder %v1072_v48, 0.0 }
 0x8a4   :  { %v1079_v52 = vsel %vm1075_vm3, %v1073_v45, %v1077_v49  ;;  %v2331_v45 = vmov 0.0  }
 0x8a5   :  { %v1081_v31 = vsel %vm442_vm4, %v1079_v52, -9e+15  ;;  %v1078_v19 = vsel %vm1074_vm6, %v1072_v48, %v1076_v50  ;;  %vm2330_vm4 = vmmov 0   ;;  %v1502_v48 = vld [vmem:[%s2734_s9 + $0x8] sm:$0xff] }
 0x8a6   :  { %v1085_v54 = vsel %vm445_vm5, %v1081_v31, -inf  ;;  %v1080_v24 = vsel %vm441_vm7, %v1078_v19, -9e+15  ;;  %1957 = vmatprep.mubr.msk.f32.mxu1 %vm2330_vm4, %v2331_v45  ;;  %v2050_v49 = vpack.c.bf16 %v1502_v48, %v1501_v46 }
 0x8a7   :  { %1086 = vmax.xlane.f32.xlu0 %v1085_v54  ;;  %v1930_v56 = vpop.f32.mrb[16].mxu1  ;;  %v1082_v57 = vsel %vm445_vm5, %v1080_v24, -inf }
 0x8a8   :  { %v1279_v60 = vadd.f32 %v1930_v56, %v1276_v55  ;;  %1083 = vmax.xlane.f32.xlu1 %v1082_v57  ;;  %v1261_v61 = vpop.f32.mrb[17].mxu1  ;;  %2051 = vmatpush3.bf16.msra.mxu1 %v2050_v49 }
 0x8a9   :  { %v1278_v62 = vadd.f32 %v1272_v59, %v1261_v61  ;;  %2052 = vmatprep.subr.bf16.mxu1 %v2329_v42 }
 0x8aa   :  { %v1283_v63 = vmul.f32 0.2, %v1279_v60  ;;  %vm1281_vm1 = vcmp.gt.f32.partialorder %v1279_v60, 0.0 }
 0x8ab   :  { %v1282_v47 = vmul.f32 0.2, %v1278_v62  ;;  %vm1280_vm2 = vcmp.gt.f32.partialorder %v1278_v62, 0.0 }
 0x8ac   :  { %v1285_v0 = vsel %vm1281_vm1, %v1279_v60, %v1283_v63 }
 0x8ad   :  { %v1287_v1 = vsel %vm651_vm8, %v1285_v0, -9e+15  ;;  %v1284_v51 = vsel %vm1280_vm2, %v1278_v62, %v1282_v47 }
 0x8ae   :  { %v1291_v2 = vsel %vm445_vm5, %v1287_v1, -inf  ;;  %v1286_v3 = vsel %vm650_vm11, %v1284_v51, -9e+15  ;;  %vm1662_vm11 = vcmask 1040384  }
 0x8af   :  { %1292 = vmax.xlane.f32.xlu1 %v1291_v2  ;;  %v1288_v4 = vsel %vm445_vm5, %v1286_v3, -inf }
 0x8b0   :  { %1289 = vmax.xlane.f32.xlu0 %v1288_v4 }
 0x934   :  { %v1087_v5 = vpop.xlane.xlu0 %1086 }
 0x935   :  { %v1089_v6 = vsub.f32 %v1081_v31, %v1087_v5  ;;  %v1084_v7 = vpop.xlane.xlu1 %1083 }
 0x936   :  { %v1088_v8 = vsub.f32 %v1080_v24, %v1084_v7 }
 0x937   :  { %v1092_v9 = vmul.f32 1.442695, %v1089_v6 }
 0x938   :  { %v1090_v10 = vmul.f32 1.442695, %v1088_v8 }
 0x939   :  { %2126 = vpow2.f32 %v1092_v9 }
 0x93a   :  { %2128 = vpow2.f32 %v1090_v10 }
 0x93c   :  { %v1293_v53 = vpop.xlane.xlu1 %1292 }
 0x93d   :  { %v1295_v11 = vsub.f32 %v1287_v1, %v1293_v53  ;;  %v1290_v12 = vpop.xlane.xlu0 %1289 }
 0x93e   :  { %v1294_v13 = vsub.f32 %v1286_v3, %v1290_v12 }
 0x93f   :  { %v1298_v14 = vmul.f32 1.442695, %v1295_v11 }
 0x940   :  { %v1296_v15 = vmul.f32 1.442695, %v1294_v13 }
 0x941   :  { %2130 = vpow2.f32 %v1298_v14  ;;  %v1503_v14 = vld [vmem:[%s2734_s9 + $0x10] sm:$0xff] }
 0x942   :  { %2132 = vpow2.f32 %v1296_v15  ;;  %v1504_v15 = vld [vmem:[%s2734_s9 + $0x18] sm:$0xff] }
 0x943   :  { %v2127_v58 = vpop.eup %2126 }
 0x944   :  { %v2129_v16 = vpop.eup %2128  ;;  %v1097_v17 = vsel %vm445_vm5, %v2127_v58, 0.0 }
 0x945   :  { %1098 = vadd.xlane.f32.xlu1 %v1097_v17  ;;  %v1094_v18 = vsel %vm445_vm5, %v2129_v16, 0.0  ;;  %v1581_v17 = vld [vmem:[#allocation11 + $0x8] sm:$0xff] }
 0x946   :  { %1095 = vadd.xlane.f32.xlu0 %v1094_v18 }
 0x94b   :  { %v2131_v20 = vpop.eup %2130 }
 0x94c   :  { %v2133_v21 = vpop.eup %2132  ;;  %v1303_v22 = vsel %vm445_vm5, %v2131_v20, 0.0 }
 0x94d   :  { %1304 = vadd.xlane.f32.xlu1 %v1303_v22  ;;  %v1300_v23 = vsel %vm445_vm5, %v2133_v21, 0.0 }
 0x94e   :  { %1301 = vadd.xlane.f32.xlu0 %v1300_v23 }
 0x9d2   :  { %v1099_v25 = vpop.xlane.xlu1 %1098 }
 0x9d3   :  { %2134 = vrcp.f32 %v1099_v25  ;;  %v1096_v27 = vpop.xlane.xlu0 %1095 }
 0x9d4   :  { %2136 = vrcp.f32 %v1096_v27  ;;  %v1582_v27 = vld [vmem:[#allocation11 + $0x10] sm:$0xff] }
 0x9da   :  { %v1305_v28 = vpop.xlane.xlu1 %1304 }
 0x9db   :  { %2138 = vrcp.f32 %v1305_v28  ;;  %v1302_v29 = vpop.xlane.xlu0 %1301  ;;  %v1583_v28 = vld [vmem:[#allocation11 + $0x18] sm:$0xff] }
 0x9dc   :  { %2140 = vrcp.f32 %v1302_v29  ;;  %v2059_v29 = vpack.c.bf16 %v1583_v28, %v1582_v27 }
 0x9dd   :  { %v2135_v30 = vpop.eup %2134 }
 0x9de   :  { %v2137_v32 = vpop.eup %2136  ;;  %v1103_v34 = vmul.f32 %v2135_v30, %v2127_v58  ;;  %v2053_v58 = vpack.c.bf16 %v1504_v15, %v1503_v14  ;;  %v1505_v30 = vld [vmem:[%s2735_s10] sm:$0x1]  ;;  %s2332_s10 = smov [#allocation13]  }
 0x9df   :  { %v1102_v33 = vmul.f32 %v2137_v32, %v2129_v16  ;;  %v1580_v16 = vld [vmem:[#allocation11] sm:$0xff] }
 0x9e0   :  { %2054 = vmatpush3.bf16.msra.mxu1 %v2053_v58  ;;  %v2056_v18 = vpack.c.bf16 %v1581_v17, %v1580_v16 }
 0x9e1   :  { %1921 = vmatprep.mubr.msk.f32.mxu0 %vm445_vm5, %v1102_v33 }
 0x9e2   :  { %1922 = vmatmul.mubr.msk.f32.vlgmr.msra.gmra.mrb[10].mxu0 %vm445_vm5, %v1103_v34 }
 0x9e3   :  { %2042 = vmatpush3.bf16.msra.mxu0 %v2637_v26  ;;  %v1424_v26 = vld [vmem:[#allocation8 + $0x10] sm:$0xff] }
 0x9e4   :  { %2043 = vmatprep.subr.bf16.mxu0 %v2329_v42  ;;  %v2047_v44 = vpack.c.bf16 %v1425_v43, %v1424_v26 }
 0x9e5   :  { %v2139_v35 = vpop.eup %2138 }
 0x9e6   :  { %v2141_v36 = vpop.eup %2140  ;;  %v1309_v38 = vmul.f32 %v2139_v35, %v2131_v20  ;;  %v1426_v20 = vld [vmem:[#allocation10] sm:$0x1] }
 0x9e7   :  { %v1308_v37 = vmul.f32 %v2141_v36, %v2133_v21  ;;  %v1658_v36 = vlaneseq }
 0x9e9   :  { %1935 = vmatprep.mubr.msk.f32.mxu0 %vm445_vm5, %v1308_v37  ;;  %v1659_v37 = vand.u32 127, %v1658_v36 }
 0x9ea   :  { %1936 = vmatmul.mubr.msk.f32.vlgmr.msra.gmra.mrb[12].mxu0 %vm445_vm5, %v1309_v38  ;;  %v1584_v38 = vld [vmem:[%s2737_s12] sm:$0x1]  ;;  %s1684_s12 = sshll.u32 %s2332_s10, 4  ;;  %s1685_s12 = int_to_ptr.vmem [resolvable:$true] %s1684_s12 }
 0x9eb   :  { %2045 = vmatpush3.bf16.msra.mxu0 %v2044_v41  ;;  %1946 = vmatprep.mubr.msk.f32.mxu0 %vm2330_vm4, %v2331_v45  ;;  %vm1660_vm10 = vcmp.lt.s32.totalorder %v1659_v37, 8  ;;  %s2286_s0 = scalar_lea.vmem %s1685_s12, 16  ;;  %s2290_s18 = scalar_lea.vmem %s1685_s12, 32 }
 0x9ec   :  { %2046 = vmatprep.subr.bf16.mxu0 %v2329_v42  ;;  %p2287_p6 = scmp.ne.s32.totalorder %s1685_s12, %s2286_s0  ;;  %p2291_p7 = scmp.lt.s32.totalorder %s1685_s12, %s1685_s12 }
 0x9ed   :  { %p2292_p8 = scmp.lt.s32.totalorder %s2290_s18, %s2286_s0 }
 0x9ef   :  { %2048 = vmatpush3.bf16.msra.mxu0 %v2047_v44  ;;  %p2293_p9 = por %p2292_p8, %p2291_p7 }
 0x9f0   :  { %2055 = vmatprep.subr.bf16.mxu0 %v2329_v42 }
 0x9f1   :  { %p2294_p10 = pnand %p2293_p9, %p2287_p6 }
 0xab5   :  { %v1923_v50 = vpop.f32.mrb[10].mxu0 }
 0xab6   :  { %v1176_v52 = vpop.f32.mrb[11].mxu0  ;;  %v1397_v31 = vmul.f32 1.442695, %v1923_v50  ;;  %vm1392_vm5 = vcmp.gt.f32.partialorder %v1923_v50, 0.0 }
 0xab7   :  { %v1395_v19 = vmul.f32 1.442695, %v1176_v52  ;;  %vm1391_vm8 = vcmp.gt.f32.partialorder %v1176_v52, 0.0 }
 0xab8   :  { %2142 = vpow2.f32 %v1397_v31 }
 0xab9   :  { %2144 = vpow2.f32 %v1395_v19 }
 0xabd   :  { %v1937_v54 = vpop.f32.mrb[12].mxu0 }
 0xabe   :  { %v1401_v24 = vmul.f32 1.442695, %v1937_v54  ;;  %v1382_v55 = vpop.f32.mrb[13].mxu0  ;;  %vm1394_vm7 = vcmp.gt.f32.partialorder %v1937_v54, 0.0 }
 0xabf   :  { %v1399_v56 = vmul.f32 1.442695, %v1382_v55  ;;  %vm1393_vm9 = vcmp.gt.f32.partialorder %v1382_v55, 0.0 }
 0xac0   :  { %2146 = vpow2.f32 %v1401_v24 }
 0xac1   :  { %2148 = vpow2.f32 %v1399_v56 }
 0xac2   :  { %v2143_v57 = vpop.eup %2142 }
 0xac3   :  { %v2145_v59 = vpop.eup %2144  ;;  %v1741_v60 = vadd.f32 -1.0, %v2143_v57 }
 0xac4   :  { %v1740_v62 = vadd.f32 -1.0, %v2145_v59 }
 0xac5   :  { %v1408_v1 = vsel %vm1392_vm5, %v1923_v50, %v1741_v60 }
 0xac6   :  { %v1407_v2 = vsel %vm1391_vm8, %v1176_v52, %v1740_v62 }
 0xaca   :  { %v2147_v61 = vpop.eup %2146 }
 0xacb   :  { %v2149_v63 = vpop.eup %2148  ;;  %v1743_v47 = vadd.f32 -1.0, %v2147_v61 }
 0xacc   :  { %v1742_v0 = vadd.f32 -1.0, %v2149_v63 }
 0xacd   :  { %v1410_v51 = vsel %vm1394_vm7, %v1937_v54, %v1743_v47 }
 0xace   :  { %v1412_v3 = vsub.f32 %v1410_v51, %v1408_v1  ;;  %v1409_v4 = vsel %vm1393_vm9, %v1382_v55, %v1742_v0 }
 0xacf   :  { %v1411_v5 = vsub.f32 %v1409_v4, %v1407_v2 }
 0xad0   :  { %v1414_v6 = vsel %vm147_vm0, %v1412_v3, 0.0 }
 0xad1   :  { %v1413_v7 = vsel %vm147_vm0, %v1411_v5, 0.0 }
 0xad2   :  { %v1415_v8 = vadd.f32 %v1414_v6, %v1413_v7 }
 0xad4   :  { %v1416_v9 = vrot.slane %v1415_v8, 4 }
 0xad6   :  { %v1417_v10 = vadd.f32 %v1416_v9, %v1415_v8 }
 0xad8   :  { %v1418_v53 = vrot.slane %v1417_v10, 2 }
 0xada   :  { %v1419_v11 = vadd.f32 %v1418_v53, %v1417_v10 }
 0xadc   :  { %v1420_v12 = vrot.slane %v1419_v11, 1 }
 0xade   :  { %v1421_v13 = vadd.f32 %v1420_v12, %v1419_v11 }
 0xae0   :  { %1947 = vmatmul.mubr.msk.f32.vlgmr.msra.gmra.mrb[14].mxu0 %vm147_vm0, %v1421_v13 }
 0xae1   :  { %1968 = vmatprep.mubr.msk.f32.mxu0 %vm2330_vm4, %v2331_v45  ;;  %2057 = vmatpush3.bf16.msra.mxu0 %v2056_v18 }
 0xae2   :  { %2058 = vmatprep.subr.bf16.mxu0 %v2329_v42 }
 0xae5   :  { %2060 = vmatpush3.bf16.msra.mxu0 %v2059_v29 }
 0xbb3   :  { %v1496_v21 = vpop.f32.mrb[14].mxu0 }
 0xbb4   :  { %v1497_v22 = vadd.f32 %v1496_v21, %v1426_v20  ;;  %v1948_v23 = vpop.f32.mrb[15].mxu0 }
 0xbb6   :  { %v1500_v25 = vmax.f32 %v1497_v22, 0.0 }
 0xbb8   :  { %1958 = vmatmul.mubr.msk.f32.vlgmr.msra.gmra.mrb[18].mxu1 %vm147_vm0, %v1500_v25 }
 0xc8b   :  { %v1575_v32 = vpop.f32.mrb[18].mxu1 }
 0xc8c   :  { %v1576_v33 = vadd.f32 %v1575_v32, %v1505_v30  ;;  %v1959_v34 = vpop.f32.mrb[19].mxu1 }
 0xc8e   :  { %v1579_v35 = vmax.f32 %v1576_v33, 0.0 }
 0xc90   :  { %1969 = vmatmul.mubr.msk.f32.vlgmr.msra.gmra.mrb[16].mxu0 %vm147_vm0, %v1579_v35 }
 0xd63   :  { %v1654_v39 = vpop.f32.mrb[16].mxu0 }
 0xd64   :  { %v1655_v40 = vadd.f32 %v1654_v39, %v1584_v38  ;;  %v1970_v41 = vpop.f32.mrb[17].mxu0 }
 0xd66   :  { %v1661_v42 = vsel %vm1660_vm10, %v1655_v40, -9e+15 }
 0xd67   :  { %v1663_v26 = vsel %vm1662_vm11, %v1661_v42, -inf }
 0xd68   :  { %1664 = vmax.xlane.f32.xlu0 %v1663_v26 }
 0xdf5   :  { %v1665_v43 = vpop.xlane.xlu0 %1664 }
 0xdf6   :  { %v1666_v44 = vsub.f32 %v1661_v42, %v1665_v43 }
 0xdf8   :  { %v1667_v45 = vmul.f32 1.442695, %v1666_v44 }
 0xdfa   :  { %2150 = vpow2.f32 %v1667_v45 }
 0xe04   :  { %v2151_v46 = vpop.eup %2150 }
 0xe05   :  { %v1669_v48 = vsel %vm1662_vm11, %v2151_v46, 0.0 }
 0xe06   :  { %1670 = vadd.xlane.f32.xlu1 %v1669_v48 }
 0xe93   :  { %v1671_v49 = vpop.xlane.xlu1 %1670 }
 0xe94   :  { %2152 = vlog2.f32 %v1671_v49 }
 0xe9e   :  { %v2153_v50 = vpop.eup %2152 }
 0xe9f   :  { %v1673_v52 = vmul.f32 0.6931472, %v2153_v50 }
 0xea1   :  { %v1674_v31 = vadd.f32 %v1673_v52, %v1665_v43 }
 0xea3   :  { %v1675_v19 = vsub.f32 %v1655_v40, %v1674_v31 }
 0xea5   :  { %v1676_v54 = vsel %vm1660_vm10, %v1675_v19, 0.0 }
 0xea6   :  { %1677 = vst [vmem:[#allocation13] sm:$0x1] %v1676_v54 }
 0xea7   :  { %2297 = shalt.err (!%p2294_p10)
}
 0xea8   :  { %s2298_s7 = scalar_lea.hbm %s2738_s13, 16 }
 0xea9   :  { %p2299_p11 = scmp.ne.s32.totalorder %s2738_s13, %s2298_s7  ;;  %p2302_p12 = scmp.lt.u32.totalorder %s2298_s7, %s2738_s13 }
 0xeab   :  { %p2304_p13 = pnand %p2302_p12, %p2299_p11 }
 0xead   :  { %2307 = shalt.err (!%p2304_p13)
}
 0xeae   :  { %1687 = dma.vmem_to_hbm [thread:$0]  %s1685_s12, 16, %s2738_s13, [#allocation4]  }
 0xeaf   :  { %2316 = dma.done.wait [#allocation4], 16  }
 0xeb0   :  { %2317 = vsyncadd [#allocation4], 4294967280 }
 0xeb1   :  { %1691 = vsyncpa [#allocation3], 1 }
 0xeb2   :  { %1692 = vsyncpa [#allocation6], 1 }
 0xeb3   :  { %1693 = vsyncpa [#allocation9], 1 }
 0xeb4   :  { %1694 = vsyncpa [#allocation12], 1 }
 0xeb5   :  { %1695 = vsyncpa [#allocation4], 1 }

</bundles_post_ra>
